<compile_context>
chip_gen: v6e
topology: v6e:2x2x1
jax: 0.10.0
libtpu: 0.0.40
codegen_flags: <defaults>
</compile_context>

<pallas_src>
import jax
import jax.numpy as jnp
from jax.experimental import pallas as pl
from jax.experimental.pallas import tpu as pltpu

LANE = 128            # lane width of a vreg (last dim)
MAX_TILE_R = 8192     # 8192 x 128 x 4 B = 4 MiB per f32 block
SUBLANE = 8


def _crelu_kernel(x_ref, y_ref):
    # Pure VPU elementwise max with 0; memory-bound, no MXU/EUP involvement.
    y_ref[...] = jnp.maximum(x_ref[...], 0.0)


def _round_up(a, m):
    return ((a + m - 1) // m) * m


def complex_relu(x):
    """ReLU applied independently to real and imaginary parts of a complex64 array."""
    if x.dtype != jnp.complex64:
        # TODO(synk): complex128 would silently lose precision here; only c64 supported.
        raise TypeError(f"complex_relu expects complex64, got {x.dtype}")

    orig_shape = x.shape
    n = x.size  # number of complex elements

    # Plane-major flat slab: [real plane | imag plane], both f32.  ReLU is
    # elementwise so the packing is semantics-neutral; concatenation keeps the
    # epilogue slices contiguous (no stride-2 gathers).
    flat = jnp.concatenate(
        [jnp.real(x).reshape(-1), jnp.imag(x).reshape(-1)]
    )  # (2n,) float32
    total = 2 * n

    # Lane-dense 2D slab (rows, 128) with sublane-aligned, VMEM-capped row
    # tiles.  Cap the tile at half the rows (rounded up to a sublane multiple)
    # so the grid has >= 2 steps whenever possible: v7x's two TensorCores both
    # get work under dimension_semantics=("parallel",).
    rows = -(-total // LANE)
    if rows > SUBLANE:
        target = _round_up(-(-rows // 2), SUBLANE)
    else:
        target = _round_up(max(rows, 1), SUBLANE)
    tile_r = min(MAX_TILE_R, target)
    rows_padded = _round_up(rows, tile_r)

    pad = rows_padded * LANE - total
    if pad:  # static decision; relu(0)=0 so zero padding is numerically safe
        flat = jnp.pad(flat, (0, pad))
    slab = flat.reshape(rows_padded, LANE)

    grid = (rows_padded // tile_r,)
    spec = pl.BlockSpec((tile_r, LANE), lambda i: (i, 0))

    slab_bytes = rows_padded * LANE * 4

    out = pl.pallas_call(
        _crelu_kernel,
        out_shape=jax.ShapeDtypeStruct(slab.shape, slab.dtype),
        grid=grid,
        in_specs=[spec],
        out_specs=spec,
        input_output_aliases={0: 0},   # in-place on the slab buffer
        cost_estimate=pl.CostEstimate(
            flops=rows_padded * LANE,
            transcendentals=0,
            bytes_accessed=2 * slab_bytes,   # one read + one write pass
        ),
        compiler_params=pltpu.CompilerParams(
            dimension_semantics=("parallel",),
            vmem_limit_bytes=32 << 20,       # 4 MiB blocks x 4 buffers = 16 MiB < 32 MiB
        ),
    )(slab)

    yflat = out.reshape(-1)
    yr = yflat[:n].reshape(orig_shape)        # contiguous slice
    yi = yflat[n:2 * n].reshape(orig_shape)   # contiguous slice
    return jax.lax.complex(yr, yi)


if __name__ == "__main__":
    key = jax.random.PRNGKey(0)
    kr, ki = jax.random.split(key)
    shape = (2, 4, 16, 16)  # NCHW, matching the PyTorch conv-style layout
    x_real = jax.random.normal(kr, shape, dtype=jnp.float32)
    x_imag = jax.random.normal(ki, shape, dtype=jnp.float32)
    x = jax.lax.complex(x_real, x_imag)  # complex64

    crelu = jax.jit(complex_relu)
    y = jax.block_until_ready(crelu(x))

    # Correctness check vs. pure-JAX reference of the PyTorch semantics.
    y_ref = jax.lax.complex(jnp.maximum(x_real, 0.0), jnp.maximum(x_imag, 0.0))
    assert y.shape == x.shape and y.dtype == jnp.complex64
    assert jnp.allclose(y, y_ref, atol=0.0, rtol=0.0)

    print("KERNEL_OK")
</pallas_src>

<mosaic_0001>
module attributes {stable_mosaic.version = 11 : i64} {
  func.func @_crelu_kernel(%arg0: i32, %arg1: memref<16x128xf32, #tpu.memory_space<vmem>>, %arg2: memref<16x128xf32, #tpu.memory_space<vmem>>) attributes {dimension_semantics = [#tpu.dimension_semantics<parallel>], iteration_bounds = array<i64: 2>, scalar_prefetch = 0 : i64, scratch_operands = 0 : i64, tpu.core_type = #tpu.core_type<tc>, window_params = [{transform_indices = @transform_0, window_bounds = array<i64: 16, 128>}, {transform_indices = @transform_1, window_bounds = array<i64: 16, 128>}]} {
    %c0 = arith.constant 0 : index
    %c0_0 = arith.constant 0 : index
    %0 = vector.load %arg1[%c0, %c0_0] : memref<16x128xf32, #tpu.memory_space<vmem>>, vector<16x128xf32>
    %cst = arith.constant 0.000000e+00 : f32
    %1 = vector.broadcast %cst : f32 to vector<16x128xf32>
    %2 = arith.maximumf %0, %1 : vector<16x128xf32>
    %c0_1 = arith.constant 0 : index
    %c0_2 = arith.constant 0 : index
    %3 = vector.load %arg2[%c0_1, %c0_2] : memref<16x128xf32, #tpu.memory_space<vmem>>, vector<16x128xf32>
    tpu.vector_store %arg2[%c0_1, %c0_2], %2 {strides = array<i32>} : memref<16x128xf32, #tpu.memory_space<vmem>>, vector<16x128xf32>,
    return
  }
  func.func @transform_0(%arg0: i32) -> (i32, i32) {
    %c0_i32 = arith.constant 0 : i32
    %c0_i32_0 = arith.constant 0 : i32
    return %arg0, %c0_i32 : i32, i32
  }
  func.func @transform_1(%arg0: i32) -> (i32, i32) {
    %c0_i32 = arith.constant 0 : i32
    %c0_i32_0 = arith.constant 0 : i32
    return %arg0, %c0_i32 : i32, i32
  }
}

</mosaic_0001>

<bundles_post_ra>
// kernel: custom-call.1
= control target key start
LH: loop header
LB: loop body
LE: loop exit
PB: predicated region body
PF: predicated region fallthrough
CT: control target
= control target key end

     0   :  { %s51_s0 = inlined_call_operand.hbm [shape: c64[2,4,16,16], index: 0, kind: input, shape index: {}]   ;;  %s52_s1 = inlined_call_operand.vmem [shape: f32[2,4,16,16], index: 1, kind: output, shape index: {}]  }
   0x1   :  { %s2_s8 = scalar_lea.hbm %s51_s0, 2048 }
   0x2   :  { %3 = vsyncpa [#allocation0], 0  ;;  %s4_s11 = sshll.u32 %s52_s1, 4  ;;  %s5_s11 = int_to_ptr.vmem [resolvable:$true] %s4_s11 }
   0x3   :  { %s20_s12 = scalar_lea.vmem %s5_s11, 2048  ;;  %p25_p1 = scmp.lt.s32.totalorder %s5_s11, %s5_s11 }
   0x4   :  { %p21_p0 = scmp.ne.s32.totalorder %s5_s11, %s20_s12  ;;  %p26_p2 = scmp.lt.s32.totalorder %s20_s12, %s20_s12 }
   0x6   :  { %p27_p3 = por %p26_p2, %p25_p1 }
   0x8   :  { %p28_p4 = pnand %p27_p3, %p21_p0 }
   0xa   :  { %31 = shalt.err (!%p28_p4)  }
   0xb   :  { %7 = dma.hbm_to_vmem [thread:$0]  %s2_s8, 2048, %s5_s11, [#allocation0] }
   0xc   :  { %33 = dma.done.wait [#allocation0], 2048  }
   0xd   :  { %34 = vsyncadd [#allocation0], 4294965248 }
   0xe   :  { %9 = vsyncpa [#allocation0], 1 }

// kernel: custom-call
= control target key start
LH: loop header
LB: loop body
LE: loop exit
PB: predicated region body
PF: predicated region fallthrough
CT: control target
= control target key end

     0   :  { %2 = vsyncpa [#allocation0], 0  ;;  %s47_s0 = inlined_call_operand.hbm [shape: c64[2,4,16,16], index: 0, kind: input, shape index: {}]   ;;  %s48_s1 = inlined_call_operand.vmem [shape: f32[2,4,16,16], index: 1, kind: output, shape index: {}]  }
   0x1   :  { %s3_s8 = sshll.u32 %s48_s1, 4  ;;  %s4_s8 = int_to_ptr.vmem [resolvable:$true] %s3_s8 }
   0x2   :  { %s17_s9 = scalar_lea.vmem %s4_s8, 2048  ;;  %p22_p1 = scmp.lt.s32.totalorder %s4_s8, %s4_s8 }
   0x3   :  { %p18_p0 = scmp.ne.s32.totalorder %s4_s8, %s17_s9  ;;  %p23_p2 = scmp.lt.s32.totalorder %s17_s9, %s17_s9 }
   0x5   :  { %p24_p3 = por %p23_p2, %p22_p1 }
   0x7   :  { %p25_p4 = pnand %p24_p3, %p18_p0 }
   0x9   :  { %28 = shalt.err (!%p25_p4)  }
   0xa   :  { %6 = dma.hbm_to_vmem [thread:$0]  %s47_s0, 2048, %s4_s8, [#allocation0] }
   0xb   :  { %29 = dma.done.wait [#allocation0], 2048  }
   0xc   :  { %30 = vsyncadd [#allocation0], 4294965248 }
   0xd   :  { %8 = vsyncpa [#allocation0], 1 }

// kernel: custom-call.2
= control target key start
LH: loop header
LB: loop body
LE: loop exit
PB: predicated region body
PF: predicated region fallthrough
CT: control target
= control target key end

     0   :  { %s92_s0 = inlined_call_operand.vmem [shape: f32[2,4,16,16], index: 0, kind: input, shape index: {}]   ;;  %s93_s1 = inlined_call_operand.vmem [shape: f32[2,4,16,16], index: 1, kind: input, shape index: {}]   ;;  %s94_s2 = inlined_call_operand.hbm [shape: c64[2,4,16,16], index: 2, kind: output, shape index: {}]  }
   0x1   :  { %s3_s11 = scalar_lea.hbm %s94_s2, 2048 }
   0x2   :  { %4 = vsyncpa [#allocation0], 0  ;;  %s5_s14 = sshll.u32 %s92_s0, 4  ;;  %s6_s14 = int_to_ptr.vmem [resolvable:$true] %s5_s14 }
   0x3   :  { %s18_s15 = scalar_lea.vmem %s6_s14, 2048  ;;  %p23_p1 = scmp.lt.s32.totalorder %s6_s14, %s6_s14 }
   0x4   :  { %p19_p0 = scmp.ne.s32.totalorder %s6_s14, %s18_s15  ;;  %p24_p2 = scmp.lt.s32.totalorder %s18_s15, %s18_s15 }
   0x6   :  { %p25_p3 = por %p24_p2, %p23_p1 }
   0x8   :  { %p26_p4 = pnand %p25_p3, %p19_p0 }
   0xa   :  { %29 = shalt.err (!%p26_p4)  }
   0xb   :  { %8 = dma.vmem_to_hbm [thread:$0]  %s6_s14, 2048, %s94_s2, [#allocation0] }
   0xc   :  { %61 = dma.done.wait [#allocation0], 2048  }
   0xd   :  { %62 = vsyncadd [#allocation0], 4294965248 }
   0xe   :  { %10 = vsyncpa [#allocation0], 1 }
   0xf   :  { %11 = vsyncpa [#allocation1], 0  ;;  %s12_s0 = sshll.u32 %s93_s1, 4  ;;  %s13_s0 = int_to_ptr.vmem [resolvable:$true] %s12_s0 }
  0x10   :  { %s38_s20 = scalar_lea.vmem %s13_s0, 2048  ;;  %p43_p6 = scmp.lt.s32.totalorder %s13_s0, %s13_s0 }
  0x11   :  { %p39_p5 = scmp.ne.s32.totalorder %s13_s0, %s38_s20  ;;  %p44_p7 = scmp.lt.s32.totalorder %s38_s20, %s38_s20 }
  0x13   :  { %p45_p8 = por %p44_p7, %p43_p6 }
  0x15   :  { %p46_p9 = pnand %p45_p8, %p39_p5 }
  0x17   :  { %49 = shalt.err (!%p46_p9)  }
  0x18   :  { %15 = dma.vmem_to_hbm [thread:$0]  %s13_s0, 2048, %s3_s11, [#allocation1] }
  0x19   :  { %63 = dma.done.wait [#allocation1], 2048  }
  0x1a   :  { %64 = vsyncadd [#allocation1], 4294965248 }
  0x1b   :  { %17 = vsyncpa [#allocation1], 1 }

// kernel: complex_relu.1
= control target key start
LH: loop header
LB: loop body
LE: loop exit
PB: predicated region body
PF: predicated region fallthrough
CT: control target
= control target key end

     0   :  { %s205_s6 = smov 0   ;;  %s225_s0 = inlined_call_operand.vmem [shape: f32[32,128], index: 0, kind: input, shape index: {}, may-alias: {0,1}]   ;;  %s226_s1 = inlined_call_operand.vmem [shape: f32[32,128], index: 1, kind: output, shape index: {}, may-alias: {0,1}]  }
   0x1 LB: > { %s182_s7 = sadd.s32 4294967295, %s207_s6   ;;  %p186_p0 = scmp.ge.s32.totalorder %s207_s6, 1  ;;  %s207_s6 = sphi %s205_s6, %s11_s6  }
   0x2   : > { %p88_p1 = scmp.lt.s32.totalorder %s207_s6, 3 }
   0x4   : > { %p89_p2 = pnand %p186_p0, %p88_p1 }
   0x5   : > { %s187_s8 = sshll.u32 (!%p89_p2), %s182_s7, 1 }
   0x6   : > { %92 = sbr.rel (%p89_p2) target bundleno = 18 (0x12), region = 24  ;;  %p109_p3 = scmp.lt.s32.totalorder (!%p89_p2), %s187_s8, 3 }
   0xb   : > { %s228_s8 = smov (!%p109_p3, %s187_s8), 3 }
   0xc   : > { %s188_s9 = sshll.u32 %s228_s8, 3 }
   0xd   : > { %s112_s12 = scalar_lea.vmem %s225_s0, %s188_s9  ;;  %s118_s15 = scalar_lea.vmem %s226_s1, %s188_s9 }
   0xe   : > { %v120_v0 = vld [vmem:[%s112_s12] sm:$0xff]  ;;  %v121_v1 = vld [vmem:[%s112_s12 + $0x8] sm:$0xff] }
   0xf   : > { %v122_v2 = vmax.f32 %v120_v0, 0.0  ;;  %v123_v3 = vmax.f32 %v121_v1, 0.0 }
  0x11   : > { %124 = vst [vmem:[%s118_s15] sm:$0xff] %v122_v2  ;;  %125 = vst [vmem:[%s118_s15 + $0x8] sm:$0xff] %v123_v3 }
  0x12 PF: > { %s11_s6 = sadd.s32 1, %s207_s6  }
  0x13   : > { %p8_p4 = scmp.ge.s32.totalorder %s11_s6, 4  }
  0x15   :  { %10 = sbr.rel (!%p8_p4) target bundleno = 1 (0x1), region = 54 }

</bundles_post_ra>
